<compile_context>
chip_gen: v6e
topology: v6e:2x2x1
jax: 0.10.0
libtpu: 0.0.40
codegen_flags: <defaults>
</compile_context>

<pallas_src>
import jax
import jax.numpy as jnp
import numpy as np
from jax.experimental import pallas as pl
from jax.experimental.pallas import tpu as pltpu

SEQ_LEN = 8
DIM_AUD = 32
NEG_SLOPE = 0.02
CONV_CHANNELS = [(DIM_AUD, 16), (16, 8), (8, 4), (4, 2), (2, 1)]

X_LANES = SEQ_LEN * DIM_AUD          # 256 lanes: one window per sublane row
MAX_BBLK = 256                       # windows (rows) per grid step

# ---------------- resident parameter/constant slab layout (static) ----------
_W_ROWS = [SEQ_LEN * cin for (cin, _) in CONV_CHANNELS]     # [256,128,64,32,16]
_W_COLS = [SEQ_LEN * cout for (_, cout) in CONV_CHANNELS]   # [128, 64,32,16, 8]

_off = 0
W_OFFS = []
for _r in _W_ROWS:
    W_OFFS.append(_off)
    _off += _r
B_OFFS = []
for _ in CONV_CHANNELS:              # one 8-row-aligned slot per conv bias
    B_OFFS.append(_off)
    _off += 8
WLIN_OFF = _off; _off += 8           # W_lin^T  (SEQ_LEN, SEQ_LEN)
BLIN_OFF = _off; _off += 8           # b_lin    (1, SEQ_LEN)
R_OFF = _off; _off += 8              # R[l, l*D+d] = 1   (SEQ_LEN, X_LANES)
S_OFF = _off; _off += X_LANES        # S[l*D+d, d] = 1   (X_LANES, DIM_AUD)
SLAB_ROWS = _off                     # 816 (multiple of 8; all offsets 8-aligned)
SLAB_COLS = X_LANES                  # 256

_LAYERS = tuple(zip(W_OFFS, _W_ROWS, _W_COLS, B_OFFS))


# --------------------------------- kernel -----------------------------------
def audio_att_kernel(slab_ref, x_ref, out_ref):
    x = x_ref[...]                                        # (BBLK, SEQ_LEN*DIM_AUD) f32

    # Conv stack: each Conv1d(k=3, pad=1) + LeakyReLU(0.02) is ONE dense matmul
    # with the pre-unrolled band weight matrix (padding & per-window isolation
    # are encoded in the zero structure -> no masks or rolls in the kernel).
    y = x
    for w_off, w_rows, w_cols, b_off in _LAYERS:          # static unroll (5 layers)
        w = slab_ref[w_off:w_off + w_rows, :w_cols]
        b = slab_ref[b_off:b_off + 1, :w_cols]
        z = jnp.dot(y, w, preferred_element_type=jnp.float32) + b
        y = jnp.where(z >= 0, z, NEG_SLOPE * z)           # LeakyReLU(0.02)

    # Linear(seq_len -> seq_len) + per-window softmax (lane-axis reductions).
    wlt = slab_ref[WLIN_OFF:WLIN_OFF + SEQ_LEN, :SEQ_LEN]
    blin = slab_ref[BLIN_OFF:BLIN_OFF + 1, :SEQ_LEN]
    logits = jnp.dot(y, wlt, preferred_element_type=jnp.float32) + blin
    logits = logits - jnp.max(logits, axis=1, keepdims=True)
    p = jnp.exp(logits)
    att = p * pl.reciprocal(jnp.sum(p, axis=1, keepdims=True), approx=False)

    # out[b, :] = sum_l att[b, l] * x[b, l, :]
    #   att @ R broadcasts att[b, l] across that frame's DIM_AUD lanes,
    #   (x * att_exp) @ S sums over frames.  R, S are resident slab constants.
    rmat = slab_ref[R_OFF:R_OFF + SEQ_LEN, :]
    smat = slab_ref[S_OFF:S_OFF + X_LANES, :DIM_AUD]
    att_exp = jnp.dot(att, rmat, preferred_element_type=jnp.float32)
    out_ref[...] = jnp.dot(x * att_exp, smat, preferred_element_type=jnp.float32)


# ------------------------------ host wrappers --------------------------------
def init_params(key):
    """Deterministic synthetic parameters (PyTorch-style shapes)."""
    params = {}
    keys = jax.random.split(key, 2 * len(CONV_CHANNELS) + 2)
    k_idx = 0
    conv = []
    for (c_in, c_out) in CONV_CHANNELS:
        w = 0.1 * jax.random.normal(keys[k_idx], (c_out, c_in, 3), jnp.float32)
        b = 0.1 * jax.random.normal(keys[k_idx + 1], (c_out,), jnp.float32)
        conv.append((w, b))
        k_idx += 2
    params["conv"] = conv
    params["w_lin"] = 0.1 * jax.random.normal(keys[k_idx], (SEQ_LEN, SEQ_LEN), jnp.float32)
    params["b_lin"] = 0.1 * jax.random.normal(keys[k_idx + 1], (SEQ_LEN,), jnp.float32)
    return params


def prepare_params(params):
    """One-time packing: unroll each Conv1d into a dense band matrix and pack
    all weights, biases and the constant R/S selectors into one f32 slab."""
    slab = np.zeros((SLAB_ROWS, SLAB_COLS), np.float32)
    for li, ((w3d, b), (cin, cout)) in enumerate(zip(params["conv"], CONV_CHANNELS)):
        w = np.asarray(w3d)                               # (cout, cin, 3) PyTorch layout
        big = np.zeros((SEQ_LEN * cin, SEQ_LEN * cout), np.float32)
        for lout in range(SEQ_LEN):
            for k in range(3):
                lin = lout + k - 1                        # padding = 1
                if 0 <= lin < SEQ_LEN:
                    big[lin * cin:(lin + 1) * cin,
                        lout * cout:(lout + 1) * cout] = w[:, :, k].T
        slab[W_OFFS[li]:W_OFFS[li] + SEQ_LEN * cin, :SEQ_LEN * cout] = big
        slab[B_OFFS[li], :SEQ_LEN * cout] = np.tile(np.asarray(b), SEQ_LEN)
    slab[WLIN_OFF:WLIN_OFF + SEQ_LEN, :SEQ_LEN] = np.asarray(params["w_lin"]).T
    slab[BLIN_OFF, :SEQ_LEN] = np.asarray(params["b_lin"])
    for l in range(SEQ_LEN):
        slab[R_OFF + l, l * DIM_AUD:(l + 1) * DIM_AUD] = 1.0
        for d in range(DIM_AUD):
            slab[S_OFF + l * DIM_AUD + d, d] = 1.0
    return jnp.asarray(slab)


def _cdiv(a, b):
    return -(-a // b)


def _round_up8(n):
    return ((n + 7) // 8) * 8


def _choose_bblk(n_windows):
    # Big blocks amortize the ~0.35us/step fixed cost, but keep >= 2 grid steps
    # (even split when possible) so the "parallel" axis shards across both v7x
    # TensorCores.  VMEM is never the limiter (~2.5 MiB total footprint).
    return int(max(8, min(MAX_BBLK, _round_up8(_cdiv(n_windows, 2)))))


def _pallas_forward(slab, x2d, n_blocks, bblk):
    return pl.pallas_call(
        audio_att_kernel,
        out_shape=jax.ShapeDtypeStruct((n_blocks * bblk, DIM_AUD), jnp.float32),
        grid_spec=pltpu.PrefetchScalarGridSpec(
            num_scalar_prefetch=0,
            grid=(n_blocks,),
            in_specs=[
                pl.BlockSpec((SLAB_ROWS, SLAB_COLS), lambda i: (0, 0)),  # resident params
                pl.BlockSpec((bblk, X_LANES), lambda i: (i, 0)),
            ],
            out_specs=pl.BlockSpec((bblk, DIM_AUD), lambda i: (i, 0)),
        ),
        compiler_params=pltpu.CompilerParams(
            dimension_semantics=("parallel",)),
    )(slab, x2d)


def audio_att_net_batched(xb, slab):
    """xb: (B, SEQ_LEN, DIM_AUD) -> (B, DIM_AUD); each window == PyTorch forward."""
    B, L, D = xb.shape
    assert L == SEQ_LEN and D == DIM_AUD
    bblk = _choose_bblk(B)
    n_blocks = _cdiv(B, bblk)
    Bp = n_blocks * bblk
    x2d = xb.astype(jnp.float32).reshape(B, X_LANES)   # frame-major, channel-minor
    if Bp != B:
        x2d = jnp.concatenate(
            [x2d, jnp.zeros((Bp - B, X_LANES), jnp.float32)], axis=0)
    out = _pallas_forward(slab, x2d, n_blocks, bblk)
    return out[:B]


def audio_att_net(x, slab):
    """Single-window forward: exactly the original module semantics."""
    return audio_att_net_batched(x[None], slab)[0]


def ref_forward(x, params):
    """Pure-JAX reference matching the PyTorch module exactly."""
    y = x[:, :DIM_AUD].T                       # (C, L)
    for (w3d, b) in params["conv"]:
        L = y.shape[1]
        y_pad = jnp.pad(y, ((0, 0), (1, 1)))
        z = sum(jnp.dot(w3d[:, :, k], y_pad[:, k:k + L]) for k in range(3))
        z = z + b[:, None]
        y = jnp.where(z >= 0, z, NEG_SLOPE * z)
    v = y.reshape(1, SEQ_LEN)
    logits = v @ params["w_lin"].T + params["b_lin"][None, :]
    att = jax.nn.softmax(logits, axis=1).reshape(SEQ_LEN, 1)
    return jnp.sum(att * x, axis=0)


if __name__ == "__main__":
    key = jax.random.PRNGKey(0)
    k_x, k_p = jax.random.split(key)
    params = init_params(k_p)
    slab = prepare_params(params)      # one-time parameter/constant packing

    # batched run: 24 audio windows of (8, 32) -> 2 grid blocks of 16 windows
    B = 24
    xb = jax.random.normal(k_x, (B, SEQ_LEN, DIM_AUD), jnp.float32)
    out = jax.block_until_ready(audio_att_net_batched(xb, slab))
    ref = jax.block_until_ready(jax.vmap(lambda x: ref_forward(x, params))(xb))
    assert out.shape == (B, DIM_AUD)
    np.testing.assert_allclose(np.asarray(out), np.asarray(ref), rtol=1e-4, atol=1e-5)

    # single-window path (original PyTorch module call signature)
    single = jax.block_until_ready(audio_att_net(xb[0], slab))
    np.testing.assert_allclose(np.asarray(single), np.asarray(ref[0]),
                               rtol=1e-4, atol=1e-5)
    print("KERNEL_OK")
</pallas_src>

<mosaic_0001>
module attributes {stable_mosaic.version = 11 : i64} {
  func.func @audio_att_kernel(%arg0: i32, %arg1: memref<816x256xf32, #tpu.memory_space<vmem>>, %arg2: memref<16x256xf32, #tpu.memory_space<vmem>>, %arg3: memref<16x32xf32, #tpu.memory_space<vmem>>) attributes {dimension_semantics = [#tpu.dimension_semantics<parallel>], iteration_bounds = array<i64: 2>, scalar_prefetch = 0 : i64, scratch_operands = 0 : i64, tpu.core_type = #tpu.core_type<tc>, window_params = [{pipeline_mode = #tpu.pipeline_mode<synchronous>, transform_indices = @transform_0, window_bounds = array<i64: 816, 256>}, {transform_indices = @transform_1, window_bounds = array<i64: 16, 256>}, {transform_indices = @transform_2, window_bounds = array<i64: 16, 32>}]} {
    %c0 = arith.constant 0 : index
    %c0_0 = arith.constant 0 : index
    %0 = vector.load %arg2[%c0, %c0_0] : memref<16x256xf32, #tpu.memory_space<vmem>>, vector<16x256xf32>
    %c0_1 = arith.constant 0 : index
    %c0_2 = arith.constant 0 : index
    %1 = vector.load %arg1[%c0_1, %c0_2] : memref<816x256xf32, #tpu.memory_space<vmem>>, vector<256x128xf32>
    %c496 = arith.constant 496 : index
    %c0_3 = arith.constant 0 : index
    %2 = vector.load %arg1[%c496, %c0_3] : memref<816x256xf32, #tpu.memory_space<vmem>>, vector<1x128xf32>
    %cst = arith.constant dense<0.000000e+00> : vector<16x128xf32>
    %3 = tpu.matmul %0, %1, %cst {dimension_numbers = #tpu.dot_dimension_numbers<[1], [0], [0], [1], [0, 0, 1, 1], [], []>} : vector<16x256xf32>, vector<256x128xf32>, vector<16x128xf32> -> vector<16x128xf32>
    %4 = vector.broadcast %2 : vector<1x128xf32> to vector<16x128xf32>
    %5 = arith.addf %3, %4 : vector<16x128xf32>
    %cst_4 = arith.constant 0.000000e+00 : f32
    %6 = vector.broadcast %cst_4 : f32 to vector<16x128xf32>
    %7 = arith.cmpf oge, %5, %6 : vector<16x128xf32>
    %cst_5 = arith.constant 2.000000e-02 : f32
    %8 = vector.broadcast %cst_5 : f32 to vector<16x128xf32>
    %9 = arith.mulf %8, %5 : vector<16x128xf32>
    %10 = arith.select %7, %5, %9 : vector<16x128xi1>, vector<16x128xf32>
    %c256 = arith.constant 256 : index
    %c0_6 = arith.constant 0 : index
    %11 = vector.load %arg1[%c256, %c0_6] : memref<816x256xf32, #tpu.memory_space<vmem>>, vector<128x64xf32>
    %c504 = arith.constant 504 : index
    %c0_7 = arith.constant 0 : index
    %12 = vector.load %arg1[%c504, %c0_7] : memref<816x256xf32, #tpu.memory_space<vmem>>, vector<1x64xf32>
    %cst_8 = arith.constant dense<0.000000e+00> : vector<16x64xf32>
    %13 = tpu.matmul %10, %11, %cst_8 {dimension_numbers = #tpu.dot_dimension_numbers<[1], [0], [0], [1], [0, 0, 1, 1], [], []>} : vector<16x128xf32>, vector<128x64xf32>, vector<16x64xf32> -> vector<16x64xf32>
    %14 = vector.broadcast %12 : vector<1x64xf32> to vector<16x64xf32>
    %15 = arith.addf %13, %14 : vector<16x64xf32>
    %cst_9 = arith.constant 0.000000e+00 : f32
    %16 = vector.broadcast %cst_9 : f32 to vector<16x64xf32>
    %17 = arith.cmpf oge, %15, %16 : vector<16x64xf32>
    %cst_10 = arith.constant 2.000000e-02 : f32
    %18 = vector.broadcast %cst_10 : f32 to vector<16x64xf32>
    %19 = arith.mulf %18, %15 : vector<16x64xf32>
    %20 = arith.select %17, %15, %19 : vector<16x64xi1>, vector<16x64xf32>
    %c384 = arith.constant 384 : index
    %c0_11 = arith.constant 0 : index
    %21 = vector.load %arg1[%c384, %c0_11] : memref<816x256xf32, #tpu.memory_space<vmem>>, vector<64x32xf32>
    %c512 = arith.constant 512 : index
    %c0_12 = arith.constant 0 : index
    %22 = vector.load %arg1[%c512, %c0_12] : memref<816x256xf32, #tpu.memory_space<vmem>>, vector<1x32xf32>
    %cst_13 = arith.constant dense<0.000000e+00> : vector<16x32xf32>
    %23 = tpu.matmul %20, %21, %cst_13 {dimension_numbers = #tpu.dot_dimension_numbers<[1], [0], [0], [1], [0, 0, 1, 1], [], []>} : vector<16x64xf32>, vector<64x32xf32>, vector<16x32xf32> -> vector<16x32xf32>
    %24 = vector.broadcast %22 : vector<1x32xf32> to vector<16x32xf32>
    %25 = arith.addf %23, %24 : vector<16x32xf32>
    %cst_14 = arith.constant 0.000000e+00 : f32
    %26 = vector.broadcast %cst_14 : f32 to vector<16x32xf32>
    %27 = arith.cmpf oge, %25, %26 : vector<16x32xf32>
    %cst_15 = arith.constant 2.000000e-02 : f32
    %28 = vector.broadcast %cst_15 : f32 to vector<16x32xf32>
    %29 = arith.mulf %28, %25 : vector<16x32xf32>
    %30 = arith.select %27, %25, %29 : vector<16x32xi1>, vector<16x32xf32>
    %c448 = arith.constant 448 : index
    %c0_16 = arith.constant 0 : index
    %31 = vector.load %arg1[%c448, %c0_16] : memref<816x256xf32, #tpu.memory_space<vmem>>, vector<32x16xf32>
    %c520 = arith.constant 520 : index
    %c0_17 = arith.constant 0 : index
    %32 = vector.load %arg1[%c520, %c0_17] : memref<816x256xf32, #tpu.memory_space<vmem>>, vector<1x16xf32>
    %cst_18 = arith.constant dense<0.000000e+00> : vector<16x16xf32>
    %33 = tpu.matmul %30, %31, %cst_18 {dimension_numbers = #tpu.dot_dimension_numbers<[1], [0], [0], [1], [0, 0, 1, 1], [], []>} : vector<16x32xf32>, vector<32x16xf32>, vector<16x16xf32> -> vector<16x16xf32>
    %34 = vector.broadcast %32 : vector<1x16xf32> to vector<16x16xf32>
    %35 = arith.addf %33, %34 : vector<16x16xf32>
    %cst_19 = arith.constant 0.000000e+00 : f32
    %36 = vector.broadcast %cst_19 : f32 to vector<16x16xf32>
    %37 = arith.cmpf oge, %35, %36 : vector<16x16xf32>
    %cst_20 = arith.constant 2.000000e-02 : f32
    %38 = vector.broadcast %cst_20 : f32 to vector<16x16xf32>
    %39 = arith.mulf %38, %35 : vector<16x16xf32>
    %40 = arith.select %37, %35, %39 : vector<16x16xi1>, vector<16x16xf32>
    %c480 = arith.constant 480 : index
    %c0_21 = arith.constant 0 : index
    %41 = vector.load %arg1[%c480, %c0_21] : memref<816x256xf32, #tpu.memory_space<vmem>>, vector<16x8xf32>
    %c528 = arith.constant 528 : index
    %c0_22 = arith.constant 0 : index
    %42 = vector.load %arg1[%c528, %c0_22] : memref<816x256xf32, #tpu.memory_space<vmem>>, vector<1x8xf32>
    %cst_23 = arith.constant dense<0.000000e+00> : vector<16x8xf32>
    %43 = tpu.matmul %40, %41, %cst_23 {dimension_numbers = #tpu.dot_dimension_numbers<[1], [0], [0], [1], [0, 0, 1, 1], [], []>} : vector<16x16xf32>, vector<16x8xf32>, vector<16x8xf32> -> vector<16x8xf32>
    %44 = vector.broadcast %42 : vector<1x8xf32> to vector<16x8xf32>
    %45 = arith.addf %43, %44 : vector<16x8xf32>
    %cst_24 = arith.constant 0.000000e+00 : f32
    %46 = vector.broadcast %cst_24 : f32 to vector<16x8xf32>
    %47 = arith.cmpf oge, %45, %46 : vector<16x8xf32>
    %cst_25 = arith.constant 2.000000e-02 : f32
    %48 = vector.broadcast %cst_25 : f32 to vector<16x8xf32>
    %49 = arith.mulf %48, %45 : vector<16x8xf32>
    %50 = arith.select %47, %45, %49 : vector<16x8xi1>, vector<16x8xf32>
    %c536 = arith.constant 536 : index
    %c0_26 = arith.constant 0 : index
    %51 = vector.load %arg1[%c536, %c0_26] : memref<816x256xf32, #tpu.memory_space<vmem>>, vector<8x8xf32>
    %c544 = arith.constant 544 : index
    %c0_27 = arith.constant 0 : index
    %52 = vector.load %arg1[%c544, %c0_27] : memref<816x256xf32, #tpu.memory_space<vmem>>, vector<1x8xf32>
    %cst_28 = arith.constant dense<0.000000e+00> : vector<16x8xf32>
    %53 = tpu.matmul %50, %51, %cst_28 {dimension_numbers = #tpu.dot_dimension_numbers<[1], [0], [0], [1], [0, 0, 1, 1], [], []>} : vector<16x8xf32>, vector<8x8xf32>, vector<16x8xf32> -> vector<16x8xf32>
    %54 = vector.broadcast %52 : vector<1x8xf32> to vector<16x8xf32>
    %55 = arith.addf %53, %54 : vector<16x8xf32>
    %cst_29 = arith.constant dense<0xFF800000> : vector<16xf32>
    %56 = vector.multi_reduction <maximumf>, %55, %cst_29 [1] : vector<16x8xf32> to vector<16xf32>
    %57 = vector.shape_cast %56 : vector<16xf32> to vector<16x1xf32>
    %58 = vector.broadcast %57 : vector<16x1xf32> to vector<16x8xf32>
    %59 = arith.subf %55, %58 : vector<16x8xf32>
    %60 = math.exp %59 : vector<16x8xf32>
    %cst_30 = arith.constant dense<0.000000e+00> : vector<16xf32>
    %61 = vector.multi_reduction <add>, %60, %cst_30 [1] : vector<16x8xf32> to vector<16xf32>
    %62 = vector.shape_cast %61 : vector<16xf32> to vector<16x1xf32>
    %63 = tpu.reciprocal %62 : vector<16x1xf32> -> vector<16x1xf32>
    %64 = vector.broadcast %63 : vector<16x1xf32> to vector<16x8xf32>
    %65 = arith.mulf %60, %64 : vector<16x8xf32>
    %c552 = arith.constant 552 : index
    %c0_31 = arith.constant 0 : index
    %66 = vector.load %arg1[%c552, %c0_31] : memref<816x256xf32, #tpu.memory_space<vmem>>, vector<8x256xf32>
    %c560 = arith.constant 560 : index
    %c0_32 = arith.constant 0 : index
    %67 = vector.load %arg1[%c560, %c0_32] : memref<816x256xf32, #tpu.memory_space<vmem>>, vector<256x32xf32>
    %cst_33 = arith.constant dense<0.000000e+00> : vector<16x256xf32>
    %68 = tpu.matmul %65, %66, %cst_33 {dimension_numbers = #tpu.dot_dimension_numbers<[1], [0], [0], [1], [0, 0, 1, 1], [], []>} : vector<16x8xf32>, vector<8x256xf32>, vector<16x256xf32> -> vector<16x256xf32>
    %69 = arith.mulf %0, %68 : vector<16x256xf32>
    %cst_34 = arith.constant dense<0.000000e+00> : vector<16x32xf32>
    %70 = tpu.matmul %69, %67, %cst_34 {dimension_numbers = #tpu.dot_dimension_numbers<[1], [0], [0], [1], [0, 0, 1, 1], [], []>} : vector<16x256xf32>, vector<256x32xf32>, vector<16x32xf32> -> vector<16x32xf32>
    %c0_35 = arith.constant 0 : index
    %c0_36 = arith.constant 0 : index
    %71 = vector.load %arg3[%c0_35, %c0_36] : memref<16x32xf32, #tpu.memory_space<vmem>>, vector<16x32xf32>
    tpu.vector_store %arg3[%c0_35, %c0_36], %70 {strides = array<i32>} : memref<16x32xf32, #tpu.memory_space<vmem>>, vector<16x32xf32>,
    return
  }
  func.func @transform_0(%arg0: i32) -> (i32, i32) {
    %c0_i32 = arith.constant 0 : i32
    %c0_i32_0 = arith.constant 0 : i32
    %c0_i32_1 = arith.constant 0 : i32
    return %c0_i32, %c0_i32_0 : i32, i32
  }
  func.func @transform_1(%arg0: i32) -> (i32, i32) {
    %c0_i32 = arith.constant 0 : i32
    %c0_i32_0 = arith.constant 0 : i32
    return %arg0, %c0_i32 : i32, i32
  }
  func.func @transform_2(%arg0: i32) -> (i32, i32) {
    %c0_i32 = arith.constant 0 : i32
    %c0_i32_0 = arith.constant 0 : i32
    return %arg0, %c0_i32 : i32, i32
  }
}

</mosaic_0001>

<bundles_post_ra>
// kernel: tpu_custom_call.1
= control target key start
LH: loop header
LB: loop body
LE: loop exit
PB: predicated region body
PF: predicated region fallthrough
CT: control target
= control target key end

     0   :  { %7 = vsyncpa [#allocation3], 0  ;;  %s1747_s0 = inlined_call_operand.hbm [shape: f32[816,256], index: 0, kind: input, shape index: {}]   ;;  %s1748_s1 = inlined_call_operand.hbm [shape: f32[32,256], index: 1, kind: input, shape index: {}]   ;;  %s1749_s2 = inlined_call_operand.hbm [shape: f32[32,32], index: 2, kind: output, shape index: {}]  }
   0x1   :  { %8 = vsyncpa [#allocation6], 0 }
   0x2   :  { %10 = vsyncpa [#allocation6 + $0x1], 0 }
   0x3   :  { %11 = vsyncpa [#allocation4], 0 }
   0x4   :  { %13 = vsyncpa [#allocation4 + $0x1], 0  ;;  %s1521_s9 = smov 0   ;;  %s1523_s10 = smov 0  }
   0x5   :  { %s1525_s11 = smov 0   ;;  %s1527_s12 = smov 0  }
   0x6 LB: > { %s1542_s13 = sadd.s32 4294967295, %s1496_s12   ;;  %s1080_s14 = sadd.s32 4294967294, %s1496_s12   ;;  %s1496_s12 = sphi %s1527_s12, %s1771_s12   ;;  %s1492_s11 = sphi %s1525_s11, %s1770_s11   ;;  %s1488_s10 = sphi %s1523_s10, %s1769_s10   ;;  %s1484_s9 = sphi %s1521_s9, %s1768_s9  }
   0x7   : > { %p60_p0 = scmp.ne.s32.totalorder %s1488_s10, %s1484_s9  ;;  %p1750_p1 = scmp.eq.s32.totalorder %s1542_s13, 0 }
   0x8   : > { %p90_p3 = scmp.eq.s32.totalorder %s1080_s14, 1  ;;  %p1081_p5 = scmp.ge.s32.totalorder %s1496_s12, 1 }
   0x9   : > { %p1551_p4 = por %p1750_p1, %p60_p0  ;;  %p97_p7 = scmp.lt.s32.totalorder %s1496_s12, 3 }
   0xa   : > { %p1556_p6 = por %p90_p3, %p60_p0  ;;  %s1498_s18 = smov [#allocation2]  }
   0xb   : > { %s1754_s15 = scalar_select %p1551_p4, 1, 0 }
   0xc   : > { %s1755_s16 = scalar_select %p1556_p6, 1, 0 }
   0xd   : > { %p1561_p8 = pnand %p1081_p5, %p97_p7  ;;  %s109_s19 = sshll.u32 %s1498_s18, 4  ;;  %s110_s19 = int_to_ptr.vmem [resolvable:$true] %s109_s19 }
   0xe   : > { %s1575_s21 = sadd.s32 1, %s1496_s12   ;;  %s47_s22 = sadd.s32 1, %s1492_s11 }
   0xf   : > { %s1756_s17 = scalar_select %p1561_p8, 1, 0 }
  0x10   : > { %p1312_p9 = pneg %p1561_p8  ;;  %s44_s23 = ssub.s32 %s1496_s12, %s1575_s21 }
  0x11   : > { %s1385_s24 = scalar_lea.vmem %s110_s19, 26112  ;;  %p1393_p5 = scmp.lt.s32.totalorder %s110_s19, %s110_s19 }
  0x12   : > { %p1570_p11 = pnand %p1312_p9, %p1750_p1  ;;  %p1386_p13 = scmp.ne.s32.totalorder %s110_s19, %s1385_s24 }
  0x13   : > { %p1394_p7 = scmp.lt.s32.totalorder %s1385_s24, %s1385_s24 }
  0x14   : > { %p1376_p12 = pneg %p1570_p11 }
  0x15   : > { %p1395_p10 = por %p1394_p7, %p1393_p5 }
  0x16   : > { %p1388_p0 = pnand %p1386_p13, %p1376_p12 }
  0x18   : > { %p1389_p3 = pneg %p1388_p0 }
  0x1a   : > { %p1396_p2 = pnand %p1395_p10, %p1389_p3 }
  0x1c   : > { %1399 = shalt.err (!%p1396_p2)
}
  0x1d   : > { %s1499_s25 = smov 256   ;;  %s1500_s26 = smov 16  }
  0x1e   : > { %1315 = dma.hbm_to_vmem [thread:$0]  (!%p1570_p11), %s1747_s0, 26112, %s110_s19, [#allocation3], %s1499_s25, %s1499_s25, %s1500_s26  }
  0x1f   : > { %p45_p2 = scmp.eq.s32.totalorder %s44_s23, 0  ;;  %p54_p9 = scmp.ne.s32.totalorder %s1492_s11, %s1488_s10 }
  0x20   : > { %p55_p10 = scmp.eq.s32.totalorder %s1496_s12, 0  ;;  %p1325_p12 = scmp.lt.s32.totalorder %s1496_s12, 2 }
  0x21   : > { %s1595_s29 = scalar_select %p45_p2, %s1492_s11, %s47_s22  }
  0x22   : > { %p56_p13 = por %p55_p10, %p54_p9  ;;  %p1758_p0 = scmp.eq.s32.totalorder %s1542_s13, 1 }
  0x23   : > { %s123_s3 = sand.u32 1, %s1492_s11   ;;  %s1108_s4 = sshll.u32 %s1496_s12, 9 }
  0x24   : > { %p1599_p3 = por %p1758_p0, %p54_p9  ;;  %s1084_s5 = sshll.u32 %s123_s3, 5 }
  0x25   : > { %s1608_s8 = scalar_lea.hbm %s1748_s1, %s1108_s4  ;;  %s127_s14 = scalar_lea.vmem [#allocation5], %s1084_s5 }
  0x26   : > { %s1759_s30 = scalar_select %p1599_p3, 1, 0 }
  0x27   : > { %s135_s18 = sshll.u32 %s127_s14, 4  ;;  %p1610_p11 = pnand %p1325_p12, %p56_p13  ;;  %s1614_s18 = int_to_ptr.vmem [resolvable:$true] %s135_s18 }
  0x28   : > { %s1616_s20 = scalar_lea.sflag [#allocation6], %s123_s3  ;;  %s1400_s22 = scalar_lea.hbm %s1608_s8, 512 }
  0x29   : > { %p1401_p5 = scmp.ne.s32.totalorder %s1608_s8, %s1400_s22  ;;  %p1402_p7 = pneg %p1610_p11 }
  0x2a   : > { %s1405_s27 = scalar_lea.hbm %s1748_s1, 1024  ;;  %p1406_p10 = scmp.lt.s32.totalorder %s1608_s8, %s1748_s1 }
  0x2b   : > { %p1403_p2 = pnand %p1402_p7, %p1401_p5  ;;  %p1407_p12 = scmp.lt.s32.totalorder %s1405_s27, %s1400_s22 }
  0x2d   : > { %p1404_p9 = pneg %p1403_p2  ;;  %p1408_p13 = por %p1407_p12, %p1406_p10 }
  0x2f   : > { %p1409_p0 = pnand %p1408_p13, %p1404_p9 }
  0x31   : > { %1412 = shalt.err (!%p1409_p0)
}
  0x32   : > { %s1413_s3 = scalar_lea.vmem %s1614_s18, 512  ;;  %s1501_s5 = smov [#allocation5]  }
  0x33   : > { %p1414_p1 = scmp.ne.s32.totalorder %s1614_s18, %s1413_s3  ;;  %s1418_s6 = sshll.u32 %s1501_s5, 4  ;;  %s1419_s6 = int_to_ptr.vmem [resolvable:$false] %s1418_s6 }
  0x34   : > { %s1420_s7 = scalar_lea.vmem %s1419_s6, 1024  ;;  %p1421_p2 = scmp.lt.s32.totalorder %s1614_s18, %s1419_s6 }
  0x35   : > { %p1416_p6 = pnand %p1414_p1, %p1402_p7  ;;  %p1422_p3 = scmp.lt.s32.totalorder %s1420_s7, %s1413_s3 }
  0x37   : > { %p1417_p5 = pneg %p1416_p6  ;;  %p1423_p4 = por %p1422_p3, %p1421_p2 }
  0x39   : > { %p1424_p8 = pnand %p1423_p4, %p1417_p5 }
  0x3b   : > { %1427 = shalt.err (!%p1424_p8)
}
  0x3c   : > { %1319 = dma.hbm_to_vmem [thread:$0]  (!%p1610_p11), %s1608_s8, 512, %s1614_s18, %s1616_s20, %s1499_s25, %s1499_s25, %s1500_s26  }
  0x3d   : > { %p1761_p1 = scmp.ne.s32.totalorder %s1756_s17, 0 }
  0x3e   : > { %p1762_p6 = scmp.eq.s32.totalorder (!%p1761_p1), %s1542_s13, 0 }
  0x3f   : > { %147 = sbr.rel (%p1761_p1) target bundleno = 2038 (0x7f6), region = 28 }
  0x44   : > { %1471 = dma.done.wait (%p1762_p6), [#allocation3], 26112   ;;  %p1763_p7 = pmov %p1762_p6 }
  0x45   : > { %s1647_s14 = sand.u32 1, %s1488_s10   ;;  %p1764_p4 = scmp.ne.s32.totalorder %s1754_s15, 0 }
  0x46   : > { %1473 = vsyncadd (%p1763_p7), [#allocation3], 4294941184  ;;  %s1090_s19 = sshll.u32 %s1647_s14, 5  ;;  %s154_s22 = scalar_lea.sflag [#allocation6], %s1647_s14 }
  0x47   : > { %s1651_s23 = scalar_lea.vmem [#allocation5], %s1090_s19 }
  0x48   : > { %1475 = dma.done.wait (%p1764_p4), %s154_s22, 512  }
  0x49   : > { %1477 = vsyncadd (%p1764_p4), %s154_s22, 4294966784  ;;  %v215_v0 = vld [vmem:[#allocation2 + $0x1f0] sm:$0xff]  ;;  %v214_v2 = vld [vmem:[#allocation2 + $0x1e0] sm:$0xff]  ;;  %vm405_vm4 = vcmask 523264   ;;  %vm498_vm7 = vcmask 261120   ;;  %vm589_vm10 = vcmask 130048  }
  0x4a   : > { %v199_v1 = vld [vmem:[#allocation2 + $0xf0] sm:$0xff]  ;;  %1110 = vmatprep.subr.mxu0 %v215_v0  ;;  %v198_v3 = vld [vmem:[#allocation2 + $0xe0] sm:$0xff]  ;;  %v1658_v13 = vld [vmem:[%s1651_s23 + $0x8] sm:$0xff]  ;;  %vm679_vm13 = vcmask 64512   ;;  %s1091_s15 = sshll.u32 %s1647_s14, 4  ;;  %s1109_s26 = sshll.u32 %s1542_s13, 8 }
  0x4b   : > { %1111 = vmatpush3.msra.mxu0 %v199_v1  ;;  %v213_v4 = vld [vmem:[#allocation2 + $0x1d0] sm:$0xff]  ;;  %v212_v6 = vld [vmem:[#allocation2 + $0x1c0] sm:$0xff]  ;;  %281 = vmatprep.mubr.f32.mxu0 %v1658_v13  ;;  %v1665_v43 = vld [vmem:[%s1651_s23 + $0x18] sm:$0xff]  ;;  %s177_s17 = scalar_lea.vmem [#allocation7], %s1091_s15  ;;  %s1703_s20 = scalar_lea.hbm %s1749_s2, %s1109_s26 }
  0x4c   : > { %1112 = vmatprep.subr.mxu0 %v214_v2  ;;  %v197_v5 = vld [vmem:[#allocation2 + $0xd0] sm:$0xff]  ;;  %v196_v7 = vld [vmem:[#allocation2 + $0xc0] sm:$0xff]  ;;  %s995_s25 = sshll.u32 %s177_s17, 4  ;;  %s982_s24 = scalar_lea.sflag [#allocation4], %s1647_s14  ;;  %s1698_s25 = int_to_ptr.vmem [resolvable:$true] %s995_s25 }
  0x4d   : > { %1113 = vmatpush3.msra.mxu0 %v198_v3  ;;  %v211_v8 = vld [vmem:[#allocation2 + $0x1b0] sm:$0xff]  ;;  %v210_v10 = vld [vmem:[#allocation2 + $0x1a0] sm:$0xff]  ;;  %s1428_s27 = scalar_lea.vmem %s1698_s25, 256  ;;  %p1765_p3 = scmp.ne.s32.totalorder %s1759_s30, 0 }
  0x4e   : > { %1114 = vmatprep.subr.mxu0 %v213_v4  ;;  %v195_v9 = vld [vmem:[#allocation2 + $0xb0] sm:$0xff]  ;;  %v194_v11 = vld [vmem:[#allocation2 + $0xa0] sm:$0xff]  ;;  %p1429_p8 = scmp.ne.s32.totalorder %s1698_s25, %s1428_s27  ;;  %s1503_s13 = smov [#allocation7]  }
  0x4f   : > { %1115 = vmatpush3.msra.mxu0 %v197_v5  ;;  %v209_v12 = vld [vmem:[#allocation2 + $0x190] sm:$0xff]  ;;  %v208_v15 = vld [vmem:[#allocation2 + $0x180] sm:$0xff]  ;;  %s1432_s28 = sshll.u32 %s1503_s13, 4  ;;  %s1433_s28 = int_to_ptr.vmem [resolvable:$false] %s1432_s28 }
  0x50   : > { %1116 = vmatprep.subr.mxu0 %v212_v6  ;;  %v193_v14 = vld [vmem:[#allocation2 + $0x90] sm:$0xff]  ;;  %v312_v17 = vld [vmem:[#allocation2 + $0x2e0] sm:$0xff]  ;;  %p1430_p11 = pnand %p1429_p8, %p1765_p3  ;;  %s1434_s4 = scalar_lea.vmem %s1433_s28, 512 }
  0x51   : > { %1117 = vmatpush3.msra.mxu0 %v196_v7  ;;  %v313_v16 = vld [vmem:[#allocation2 + $0x2f0] sm:$0xff]  ;;  %v192_v18 = vld [vmem:[#allocation2 + $0x80] sm:$0xff]  ;;  %p1435_p10 = scmp.lt.s32.totalorder %s1698_s25, %s1433_s28  ;;  %p1436_p12 = scmp.lt.s32.totalorder %s1434_s4, %s1428_s27 }
  0x52   : > { %1118 = vmatprep.subr.mxu0 %v211_v8  ;;  %1227 = vmatprep.subr.mxu1 %v313_v16  ;;  %v207_v19 = vld [vmem:[#allocation2 + $0x170] sm:$0xff]  ;;  %v206_v22 = vld [vmem:[#allocation2 + $0x160] sm:$0xff]  ;;  %p1431_p9 = pneg %p1430_p11 }
  0x53   : > { %1119 = vmatpush3.msra.mxu0 %v195_v9  ;;  %1228 = vmatpush3.msra.mxu1 %v313_v16  ;;  %v311_v20 = vld [vmem:[#allocation2 + $0x2d0] sm:$0xff]  ;;  %v310_v23 = vld [vmem:[#allocation2 + $0x2c0] sm:$0xff]  ;;  %p1437_p13 = por %p1436_p12, %p1435_p10 }
  0x54   : > { %1120 = vmatprep.subr.mxu0 %v210_v10  ;;  %v191_v21 = vld [vmem:[#allocation2 + $0x70] sm:$0xff]  ;;  %1229 = vmatprep.subr.mxu1 %v312_v17  ;;  %v190_v24 = vld [vmem:[#allocation2 + $0x60] sm:$0xff] }
  0x55   : > { %1121 = vmatpush3.msra.mxu0 %v194_v11  ;;  %1230 = vmatpush3.msra.mxu1 %v312_v17  ;;  %v205_v25 = vld [vmem:[#allocation2 + $0x150] sm:$0xff]  ;;  %v204_v28 = vld [vmem:[#allocation2 + $0x140] sm:$0xff]  ;;  %p1438_p0 = pnand %p1437_p13, %p1431_p9 }
  0x56   : > { %1122 = vmatprep.subr.mxu0 %v209_v12  ;;  %1231 = vmatprep.subr.mxu1 %v311_v20  ;;  %v309_v26 = vld [vmem:[#allocation2 + $0x2b0] sm:$0xff]  ;;  %v308_v29 = vld [vmem:[#allocation2 + $0x2a0] sm:$0xff] }
  0x57   : > { %1123 = vmatpush3.msra.mxu0 %v193_v14  ;;  %1232 = vmatpush3.msra.mxu1 %v311_v20  ;;  %v189_v27 = vld [vmem:[#allocation2 + $0x50] sm:$0xff]  ;;  %v188_v30 = vld [vmem:[#allocation2 + $0x40] sm:$0xff] }
  0x58   : > { %1124 = vmatprep.subr.mxu0 %v208_v15  ;;  %1233 = vmatprep.subr.mxu1 %v310_v23  ;;  %v203_v31 = vld [vmem:[#allocation2 + $0x130] sm:$0xff]  ;;  %v202_v34 = vld [vmem:[#allocation2 + $0x120] sm:$0xff] }
  0x59   : > { %1125 = vmatpush3.msra.mxu0 %v192_v18  ;;  %1234 = vmatpush3.msra.mxu1 %v310_v23  ;;  %v307_v32 = vld [vmem:[#allocation2 + $0x290] sm:$0xff]  ;;  %v306_v35 = vld [vmem:[#allocation2 + $0x280] sm:$0xff] }
  0x5a   : > { %1126 = vmatprep.subr.mxu0 %v207_v19  ;;  %1235 = vmatprep.subr.mxu1 %v309_v26  ;;  %v187_v33 = vld [vmem:[#allocation2 + $0x30] sm:$0xff]  ;;  %v186_v36 = vld [vmem:[#allocation2 + $0x20] sm:$0xff] }
  0x5b   : > { %1127 = vmatpush3.msra.mxu0 %v191_v21  ;;  %1236 = vmatpush3.msra.mxu1 %v309_v26  ;;  %v201_v37 = vld [vmem:[#allocation2 + $0x110] sm:$0xff]  ;;  %v200_v40 = vld [vmem:[#allocation2 + $0x100] sm:$0xff] }
  0x5c   : > { %1128 = vmatprep.subr.mxu0 %v206_v22  ;;  %1237 = vmatprep.subr.mxu1 %v308_v29  ;;  %v305_v38 = vld [vmem:[#allocation2 + $0x270] sm:$0xff]  ;;  %v184_v41 = vld [vmem:[#allocation2] sm:$0xff] }
  0x5d   : > { %1129 = vmatpush3.msra.mxu0 %v190_v24  ;;  %1238 = vmatpush3.msra.mxu1 %v308_v29  ;;  %v185_v39 = vld [vmem:[#allocation2 + $0x10] sm:$0xff]  ;;  %v1662_v42 = vld [vmem:[%s1651_s23] sm:$0xff] }
  0x5e   : > { %1130 = vmatprep.subr.mxu0 %v205_v25  ;;  %1239 = vmatprep.subr.mxu1 %v307_v32  ;;  %v1670_v44 = vld [vmem:[%s1651_s23 + $0x10] sm:$0xff]  ;;  %v304_v45 = vld [vmem:[#allocation2 + $0x260] sm:$0xff] }
  0x5f   : > { %1131 = vmatpush3.msra.mxu0 %v189_v27  ;;  %1240 = vmatpush3.msra.mxu1 %v307_v32  ;;  %v303_v46 = vld [vmem:[#allocation2 + $0x250] sm:$0xff]  ;;  %v302_v47 = vld [vmem:[#allocation2 + $0x240] sm:$0xff] }
  0x60   : > { %1132 = vmatprep.subr.mxu0 %v204_v28  ;;  %1241 = vmatprep.subr.mxu1 %v306_v35  ;;  %v301_v48 = vld [vmem:[#allocation2 + $0x230] sm:$0xff]  ;;  %v300_v49 = vld [vmem:[#allocation2 + $0x220] sm:$0xff] }
  0x61   : > { %1133 = vmatpush3.msra.mxu0 %v188_v30  ;;  %1242 = vmatpush3.msra.mxu1 %v306_v35  ;;  %v299_v50 = vld [vmem:[#allocation2 + $0x210] sm:$0xff]  ;;  %v298_v51 = vld [vmem:[#allocation2 + $0x200] sm:$0xff] }
  0x62   : > { %1134 = vmatprep.subr.mxu0 %v203_v31  ;;  %1243 = vmatprep.subr.mxu1 %v305_v38  ;;  %v403_v52 = vld [vmem:[#allocation2 + $0x370] sm:$0xff]  ;;  %v402_v53 = vld [vmem:[#allocation2 + $0x360] sm:$0xff] }
  0x63   : > { %1135 = vmatpush3.msra.mxu0 %v187_v33  ;;  %1244 = vmatpush3.msra.mxu1 %v305_v38  ;;  %v401_v54 = vld [vmem:[#allocation2 + $0x350] sm:$0xff]  ;;  %v400_v55 = vld [vmem:[#allocation2 + $0x340] sm:$0xff] }
  0x64   : > { %1136 = vmatprep.subr.mxu0 %v202_v34  ;;  %1245 = vmatprep.subr.mxu1 %v304_v45  ;;  %v216_v57 = vld [vmem:[#allocation2 + $0x3e0] ss:$0 sm:$0xff]  ;;  %v399_v5 = vld [vmem:[#allocation2 + $0x330] sm:$0xff] }
  0x65   : > { %1137 = vmatpush3.msra.mxu0 %v186_v36  ;;  %1246 = vmatpush3.msra.mxu1 %v304_v45  ;;  %v398_v6 = vld [vmem:[#allocation2 + $0x320] sm:$0xff]  ;;  %v397_v7 = vld [vmem:[#allocation2 + $0x310] sm:$0xff] }
  0x66   : > { %1138 = vmatprep.subr.mxu0 %v201_v37  ;;  %1247 = vmatprep.subr.mxu1 %v303_v46  ;;  %v396_v8 = vld [vmem:[#allocation2 + $0x300] sm:$0xff]  ;;  %v314_v9 = vld [vmem:[#allocation2 + $0x3f0] ss:$0 sm:$0xff] }
  0x67   : > { %1139 = vmatpush3.msra.mxu0 %v185_v39  ;;  %1248 = vmatpush3.msra.mxu1 %v303_v46  ;;  %v496_v19 = vld [vmem:[#allocation2 + $0x3b0] sm:$0xff]  ;;  %v495_v20 = vld [vmem:[#allocation2 + $0x3a0] sm:$0xff] }
  0x68   : > { %1140 = vmatprep.subr.mxu0 %v200_v40  ;;  %1249 = vmatprep.subr.mxu1 %v302_v47  ;;  %v494_v21 = vld [vmem:[#allocation2 + $0x390] sm:$0xff]  ;;  %v493_v22 = vld [vmem:[#allocation2 + $0x380] sm:$0xff] }
  0x69   : > { %1141 = vmatpush3.msra.mxu0 %v184_v41  ;;  %1250 = vmatpush3.msra.mxu1 %v302_v47  ;;  %v404_v23 = vld [vmem:[#allocation2 + $0x400] ss:$0 sm:$0xff]  ;;  %v587_v32 = vld [vmem:[#allocation2 + $0x3d0] sm:$0xff] }
  0x6a   : > { %282 = vmatmul.mubr.f32.vlgmr.msra.gmra.mxu0 %v1662_v42  ;;  %1251 = vmatprep.subr.mxu1 %v301_v48  ;;  %v586_v33 = vld [vmem:[#allocation2 + $0x3c0] sm:$0xff]  ;;  %v497_v34 = vld [vmem:[#allocation2 + $0x410] ss:$0 sm:$0xff] }
  0x6b   : > { %286 = vmatprep.mubr.f32.mxu0 %v1665_v43  ;;  %1252 = vmatpush3.msra.mxu1 %v301_v48  ;;  %v677_v46 = vld [vmem:[#allocation2 + $0x430] sm:$0xff]  ;;  %v588_v47 = vld [vmem:[#allocation2 + $0x420] ss:$0 sm:$0xff] }
  0x6c   : > { %1253 = vmatprep.subr.mxu1 %v300_v49  ;;  %1262 = vmatprep.subr.mxu0 %v403_v52 }
  0x6d   : > { %1254 = vmatpush3.msra.mxu1 %v300_v49  ;;  %1263 = vmatpush3.msra.mxu0 %v403_v52 }
  0x6e   : > { %287 = vmatmul.mubr.f32.gmra.mxu0 %v1670_v44  ;;  %1255 = vmatprep.subr.mxu1 %v299_v50 }
  0x6f   : > { %1256 = vmatpush3.msra.mxu1 %v299_v50  ;;  %1264 = vmatprep.subr.mxu0 %v402_v53 }
  0x70   : > { %1257 = vmatprep.subr.mxu1 %v298_v51  ;;  %1265 = vmatpush3.msra.mxu0 %v402_v53 }
  0x71   : > { %1258 = vmatpush3.msra.mxu1 %v298_v51  ;;  %1266 = vmatprep.subr.mxu0 %v401_v54 }
  0x72   : > { %1267 = vmatpush3.msra.mxu0 %v401_v54  ;;  %1299 = vmatprep.subr.mxu1 %v677_v46 }
  0x73   : > { %1268 = vmatprep.subr.mxu0 %v400_v55 }
  0x74   : > { %1269 = vmatpush3.msra.mxu0 %v400_v55 }
  0x75   : > { %1270 = vmatprep.subr.mxu0 %v399_v5 }
  0x76   : > { %1271 = vmatpush3.msra.mxu0 %v399_v5 }
  0x77   : > { %1272 = vmatprep.subr.mxu0 %v398_v6 }
  0x78   : > { %1273 = vmatpush3.msra.mxu0 %v398_v6 }
  0x79   : > { %1274 = vmatprep.subr.mxu0 %v397_v7 }
  0x7a   : > { %1275 = vmatpush3.msra.mxu0 %v397_v7 }
  0x7b   : > { %1276 = vmatprep.subr.mxu0 %v396_v8 }
  0x7c   : > { %1277 = vmatpush3.msra.mxu0 %v396_v8 }
  0x7d   : > { %1281 = vmatprep.subr.mxu0 %v496_v19 }
 0x12a   : > { %v1142_v56 = vpop.f32.mrf.mxu0 }
 0x12c   : > { %v1143_v58 = vpop.f32.mrf.mxu0 }
 0x12d   : > { %v1144_v59 = vadd.f32 %v1143_v58, %v1142_v56 }
 0x12e   : > { %v1145_v60 = vpop.f32.mrf.mxu0 }
 0x12f   : > { %v284_v61 = vadd.f32 %v1144_v59, %v216_v57 }
 0x130   : > { %v1146_v62 = vpop.f32.mrf.mxu0 }
 0x131   : > { %v1147_v63 = vadd.f32 %v1146_v62, %v1145_v60  ;;  %vm292_vm0 = vcmp.ge.f32.partialorder %v284_v61, 0.0  ;;  %v294_v0 = vmul.f32 0.02, %v284_v61 }
 0x133   : > { %v289_v1 = vadd.f32 %v1147_v63, %v216_v57  ;;  %v296_v2 = vsel %vm292_vm0, %v284_v61, %v294_v0  ;;  %v678_v57 = vld [vmem:[#allocation2 + $0x440] ss:$0 sm:$0xff] }
 0x134   : > { %1259 = vmatprep.mubr.f32.mxu1 %v296_v2 }
 0x135   : > { %vm293_vm1 = vcmp.ge.f32.partialorder %v289_v1, 0.0  ;;  %v295_v3 = vmul.f32 0.02, %v289_v1 }
 0x137   : > { %v297_v4 = vsel %vm293_vm1, %v289_v1, %v295_v3 }
 0x138   : > { %1260 = vmatmul.mubr.f32.vlgmr.msra.gmra.mxu1 %v297_v4 }
 0x139   : > { %1300 = vmatpush3.msra.mxu1 %v677_v46 }
 0x1f8   : > { %v1261_v10 = vpop.f32.mrf.mxu1 }
 0x1f9   : > { %v387_v11 = vadd.f32 %v1261_v10, %v314_v9  ;;  %v783_v10 = vld [vmem:[#allocation2 + $0x450] sm:$0xff] }
 0x1fa   : > { %v381_v12 = vpop.f32.mrf.mxu1 }
 0x1fb   : > { %v382_v14 = vadd.f32 %v381_v12, %v314_v9  ;;  %v393_v15 = vmul.f32 0.02, %v387_v11  ;;  %vm391_vm2 = vcmp.ge.f32.partialorder %v387_v11, 0.0  ;;  %v784_v9 = vld [vmem:[#allocation2 + $0x458] sm:$0xff]  ;;  %v816_v12 = vld [vmem:[#allocation2 + $0x650] sm:$0xff] }
 0x1fc   : > { %1189 = vmatprep.subr.mxu1 %v816_v12 }
 0x1fd   : > { %vm390_vm3 = vcmp.ge.f32.partialorder %v382_v14, 0.0  ;;  %v392_v16 = vmul.f32 0.02, %v382_v14  ;;  %v395_v18 = vsel %vm391_vm2, %v387_v11, %v393_v15  ;;  %v1502_v11 = vmov 0.0   ;;  %v815_v15 = vld [vmem:[#allocation2 + $0x640] sm:$0xff] }
 0x1ff   : > { %v394_v17 = vsel %vm390_vm3, %v382_v14, %v392_v16  ;;  %v800_v14 = vld [vmem:[#allocation2 + $0x550] sm:$0xff]  ;;  %v799_v16 = vld [vmem:[#allocation2 + $0x540] sm:$0xff] }
 0x200   : > { %1278 = vmatprep.mubr.msk.f32.mxu0 %vm405_vm4, %v394_v17  ;;  %v814_v17 = vld [vmem:[#allocation2 + $0x630] sm:$0xff] }
 0x201   : > { %1279 = vmatmul.mubr.msk.f32.vlgmr.msra.gmra.mxu0 %vm405_vm4, %v395_v18  ;;  %v798_v18 = vld [vmem:[#allocation2 + $0x530] sm:$0xff] }
 0x202   : > { %1282 = vmatpush3.msra.mxu0 %v496_v19  ;;  %v813_v19 = vld [vmem:[#allocation2 + $0x620] sm:$0xff] }
 0x203   : > { %1283 = vmatprep.subr.mxu0 %v495_v20 }
 0x204   : > { %1284 = vmatpush3.msra.mxu0 %v495_v20  ;;  %v797_v20 = vld [vmem:[#allocation2 + $0x520] sm:$0xff] }
 0x205   : > { %1285 = vmatprep.subr.mxu0 %v494_v21 }
 0x206   : > { %1286 = vmatpush3.msra.mxu0 %v494_v21  ;;  %v812_v21 = vld [vmem:[#allocation2 + $0x610] sm:$0xff] }
 0x207   : > { %1287 = vmatprep.subr.mxu0 %v493_v22 }
 0x208   : > { %1288 = vmatpush3.msra.mxu0 %v493_v22  ;;  %v796_v22 = vld [vmem:[#allocation2 + $0x510] sm:$0xff] }
 0x209   : > { %1292 = vmatprep.subr.mxu0 %v587_v32 }
 0x2c1   : > { %v1280_v24 = vpop.f32.mrf.mxu0 }
 0x2c2   : > { %v484_v25 = vadd.f32 %v1280_v24, %v404_v23  ;;  %v795_v24 = vld [vmem:[#allocation2 + $0x500] sm:$0xff] }
 0x2c3   : > { %v478_v26 = vpop.f32.mrf.mxu0 }
 0x2c4   : > { %v479_v27 = vadd.f32 %v478_v26, %v404_v23  ;;  %v490_v28 = vmul.f32 0.02, %v484_v25  ;;  %vm488_vm5 = vcmp.ge.f32.partialorder %v484_v25, 0.0  ;;  %v811_v23 = vld [vmem:[#allocation2 + $0x600] sm:$0xff]  ;;  %v794_v26 = vld [vmem:[#allocation2 + $0x4f0] sm:$0xff] }
 0x2c6   : > { %vm487_vm6 = vcmp.ge.f32.partialorder %v479_v27, 0.0  ;;  %v489_v29 = vmul.f32 0.02, %v479_v27  ;;  %v492_v31 = vsel %vm488_vm5, %v484_v25, %v490_v28  ;;  %v810_v25 = vld [vmem:[#allocation2 + $0x5f0] sm:$0xff]  ;;  %v793_v28 = vld [vmem:[#allocation2 + $0x4e0] sm:$0xff] }
 0x2c8   : > { %v491_v30 = vsel %vm487_vm6, %v479_v27, %v489_v29  ;;  %v809_v27 = vld [vmem:[#allocation2 + $0x5e0] sm:$0xff]  ;;  %v808_v29 = vld [vmem:[#allocation2 + $0x5d0] sm:$0xff] }
 0x2c9   : > { %1289 = vmatprep.mubr.msk.f32.mxu0 %vm498_vm7, %v491_v30  ;;  %v792_v30 = vld [vmem:[#allocation2 + $0x4d0] sm:$0xff] }
 0x2ca   : > { %1290 = vmatmul.mubr.msk.f32.vlgmr.msra.gmra.mxu0 %vm498_vm7, %v492_v31  ;;  %v807_v31 = vld [vmem:[#allocation2 + $0x5c0] sm:$0xff] }
 0x2cb   : > { %1293 = vmatpush3.msra.mxu0 %v587_v32  ;;  %v791_v32 = vld [vmem:[#allocation2 + $0x4c0] sm:$0xff] }
 0x2cc   : > { %1294 = vmatprep.subr.mxu0 %v586_v33 }
 0x2cd   : > { %1295 = vmatpush3.msra.mxu0 %v586_v33  ;;  %v806_v33 = vld [vmem:[#allocation2 + $0x5b0] sm:$0xff] }
 0x2ce   : > { %853 = vmatprep.subr.mxu0 %v784_v9 }
 0x38a   : > { %v1291_v35 = vpop.f32.mrf.mxu0 }
 0x38b   : > { %v577_v36 = vadd.f32 %v1291_v35, %v497_v34  ;;  %v805_v35 = vld [vmem:[#allocation2 + $0x5a0] sm:$0xff] }
 0x38c   : > { %v571_v37 = vpop.f32.mrf.mxu0 }
 0x38d   : > { %v572_v38 = vadd.f32 %v571_v37, %v497_v34  ;;  %v583_v39 = vmul.f32 0.02, %v577_v36  ;;  %vm581_vm8 = vcmp.ge.f32.partialorder %v577_v36, 0.0  ;;  %v790_v34 = vld [vmem:[#allocation2 + $0x4b0] sm:$0xff] }
 0x38e   : > { %v804_v37 = vld [vmem:[#allocation2 + $0x590] sm:$0xff] }
 0x38f   : > { %vm580_vm9 = vcmp.ge.f32.partialorder %v572_v38, 0.0  ;;  %v582_v40 = vmul.f32 0.02, %v572_v38  ;;  %v585_v45 = vsel %vm581_vm8, %v577_v36, %v583_v39  ;;  %v789_v36 = vld [vmem:[#allocation2 + $0x4a0] sm:$0xff] }
 0x391   : > { %v584_v41 = vsel %vm580_vm9, %v572_v38, %v582_v40  ;;  %v788_v38 = vld [vmem:[#allocation2 + $0x490] sm:$0xff] }
 0x392   : > { %1296 = vmatprep.mubr.msk.f32.mxu0 %vm589_vm10, %v584_v41 }
 0x393   : > { %1297 = vmatmul.mubr.msk.f32.vlgmr.msra.gmra.mxu0 %vm589_vm10, %v585_v45 }
 0x394   : > { %887 = vmatprep.mubr.f32.mxu0 %v1502_v11  ;;  %854 = vmatpush1.msra.mxu0 %v783_v10 }
 0x453   : > { %v1298_v48 = vpop.f32.mrf.mxu0 }
 0x454   : > { %v668_v49 = vadd.f32 %v1298_v48, %v588_v47  ;;  %v803_v48 = vld [vmem:[#allocation2 + $0x580] sm:$0xff] }
 0x455   : > { %v662_v50 = vpop.f32.mrf.mxu0 }
 0x456   : > { %v663_v51 = vadd.f32 %v662_v50, %v588_v47  ;;  %v674_v52 = vmul.f32 0.02, %v668_v49  ;;  %vm672_vm11 = vcmp.ge.f32.partialorder %v668_v49, 0.0  ;;  %v802_v50 = vld [vmem:[#allocation2 + $0x570] sm:$0xff] }
 0x458   : > { %vm671_vm12 = vcmp.ge.f32.partialorder %v663_v51, 0.0  ;;  %v673_v53 = vmul.f32 0.02, %v663_v51  ;;  %v676_v55 = vsel %vm672_vm11, %v668_v49, %v674_v52  ;;  %v787_v49 = vld [vmem:[#allocation2 + $0x480] sm:$0xff] }
 0x459   : > { %v801_v52 = vld [vmem:[#allocation2 + $0x560] sm:$0xff] }
 0x45a   : > { %v675_v54 = vsel %vm671_vm12, %v663_v51, %v673_v53  ;;  %v786_v51 = vld [vmem:[#allocation2 + $0x470] sm:$0xff]  ;;  %v785_v53 = vld [vmem:[#allocation2 + $0x460] sm:$0xff] }
 0x45b   : > { %1301 = vmatprep.mubr.msk.f32.mxu1 %vm679_vm13, %v675_v54 }
 0x45c   : > { %1302 = vmatmul.mubr.msk.f32.vlgmr.msra.gmra.mxu1 %vm679_vm13, %v676_v55 }
 0x45d   : > { %1190 = vmatpush3.msra.mxu1 %v800_v14 }
 0x45e   : > { %1191 = vmatprep.subr.mxu1 %v815_v15 }
 0x45f   : > { %1192 = vmatpush3.msra.mxu1 %v799_v16 }
 0x460   : > { %1193 = vmatprep.subr.mxu1 %v814_v17 }
 0x461   : > { %1194 = vmatpush3.msra.mxu1 %v798_v18 }
 0x462   : > { %1195 = vmatprep.subr.mxu1 %v813_v19 }
 0x463   : > { %1196 = vmatpush3.msra.mxu1 %v797_v20 }
 0x464   : > { %1197 = vmatprep.subr.mxu1 %v812_v21 }
 0x465   : > { %1198 = vmatpush3.msra.mxu1 %v796_v22 }
 0x466   : > { %1199 = vmatprep.subr.mxu1 %v811_v23 }
 0x467   : > { %1200 = vmatpush3.msra.mxu1 %v795_v24 }
 0x468   : > { %1201 = vmatprep.subr.mxu1 %v810_v25 }
 0x469   : > { %1202 = vmatpush3.msra.mxu1 %v794_v26 }
 0x46a   : > { %1203 = vmatprep.subr.mxu1 %v809_v27 }
 0x46b   : > { %1204 = vmatpush3.msra.mxu1 %v793_v28 }
 0x46c   : > { %1205 = vmatprep.subr.mxu1 %v808_v29 }
 0x46d   : > { %1206 = vmatpush3.msra.mxu1 %v792_v30 }
 0x46e   : > { %1207 = vmatprep.subr.mxu1 %v807_v31 }
 0x46f   : > { %1208 = vmatpush3.msra.mxu1 %v791_v32 }
 0x470   : > { %1209 = vmatprep.subr.mxu1 %v806_v33 }
 0x471   : > { %1210 = vmatpush3.msra.mxu1 %v790_v34 }
 0x472   : > { %1211 = vmatprep.subr.mxu1 %v805_v35 }
 0x473   : > { %1212 = vmatpush3.msra.mxu1 %v789_v36 }
 0x474   : > { %1213 = vmatprep.subr.mxu1 %v804_v37 }
 0x475   : > { %1214 = vmatpush3.msra.mxu1 %v788_v38 }
 0x476   : > { %1215 = vmatprep.subr.mxu1 %v803_v48 }
 0x477   : > { %1216 = vmatpush3.msra.mxu1 %v787_v49 }
 0x478   : > { %1217 = vmatprep.subr.mxu1 %v802_v50 }
 0x479   : > { %1218 = vmatpush3.msra.mxu1 %v786_v51 }
 0x47a   : > { %1219 = vmatprep.subr.mxu1 %v801_v52 }
 0x47b   : > { %1220 = vmatpush3.msra.mxu1 %v785_v53 }
 0x51c   : > { %v1303_v56 = vpop.f32.mrf.mxu1 }
 0x51d   : > { %v758_v60 = vadd.f32 %v1303_v56, %v678_v57 }
 0x51e   : > { %v752_v58 = vpop.f32.mrf.mxu1 }
 0x51f   : > { %v753_v59 = vadd.f32 %v752_v58, %v678_v57  ;;  %v764_v62 = vsel %vm679_vm13, %v758_v60, -inf }
 0x521   : > { %v761_v61 = vsel %vm679_vm13, %v753_v59, -inf }
 0x522   : > { %762 = vmax.xlane.f32.xlu0 %v761_v61 }
 0x526   : > { %765 = vmax.xlane.f32.xlu0 %v764_v62 }
 0x5ab   : > { %v763_v63 = vpop.xlane.xlu0 %762 }
 0x5ac   : > { %v767_v0 = vsub.f32 %v753_v59, %v763_v63 }
 0x5ae   : > { %v769_v1 = vmul.f32 1.442695, %v767_v0 }
 0x5af   : > { %v766_v2 = vpop.xlane.xlu0 %765 }
 0x5b0   : > { %1366 = vpow2.f32 %v769_v1  ;;  %v768_v3 = vsub.f32 %v758_v60, %v766_v2 }
 0x5b2   : > { %v771_v4 = vmul.f32 1.442695, %v768_v3 }
 0x5b4   : > { %1368 = vpow2.f32 %v771_v4 }
 0x5bd   : > { %v1679_v5 = vpop.eup %1366 }
 0x5be   : > { %v773_v6 = vsel %vm679_vm13, %v1679_v5, 0.0 }
 0x5bf   : > { %774 = vadd.xlane.f32.xlu1 %v773_v6 }
 0x5c1   : > { %v1683_v7 = vpop.eup %1368 }
 0x5c2   : > { %v776_v8 = vsel %vm679_vm13, %v1683_v7, 0.0 }
 0x5c3   : > { %777 = vadd.xlane.f32.xlu1 %v776_v8 }
 0x648   : > { %v775_v39 = vpop.xlane.xlu1 %774 }
 0x649   : > { %1370 = vrcp.f32 %v775_v39 }
 0x64c   : > { %v778_v40 = vpop.xlane.xlu1 %777 }
 0x64d   : > { %1372 = vrcp.f32 %v778_v40 }
 0x656   : > { %v1371_v41 = vpop.eup %1370 }
 0x657   : > { %v781_v45 = vmul.f32 %v1371_v41, %v1679_v5 }
 0x659   : > { %1100 = vmatmul.mubr.msk.f32.vlgmr.msra.gmra.mxu0 %vm679_vm13, %v781_v45 }
 0x65a   : > { %v1373_v46 = vpop.eup %1372  ;;  %893 = vmatprep.mubr.f32.mxu0 %v1502_v11 }
 0x65b   : > { %v782_v47 = vmul.f32 %v1373_v46, %v1683_v7 }
 0x65d   : > { %1101 = vmatmul.mubr.msk.f32.gmra.mxu0 %vm679_vm13, %v782_v47 }
 0x719   : > { %v889_v54 = vpop.f32.mrf.mxu0 }
 0x71a   : > { %v900_v57 = vmul.f32 %v889_v54, %v1662_v42 }
 0x71b   : > { %v891_v55 = vpop.f32.mrf.mxu0 }
 0x71c   : > { %v901_v56 = vmul.f32 %v891_v55, %v1658_v13 }
 0x71d   : > { %v895_v58 = vpop.f32.mrf.mxu0 }
 0x71e   : > { %968 = vmatprep.mubr.f32.mxu1 %v901_v56  ;;  %v902_v61 = vmul.f32 %v895_v58, %v1670_v44 }
 0x71f   : > { %v897_v59 = vpop.f32.mrf.mxu0  ;;  %969 = vmatmul.mubr.f32.vlgmr.msra.gmra.mxu1 %v900_v57 }
 0x720   : > { %v903_v60 = vmul.f32 %v897_v59, %v1665_v43 }
 0x722   : > { %973 = vmatprep.mubr.f32.mxu1 %v903_v60 }
 0x723   : > { %974 = vmatmul.mubr.f32.gmra.mxu1 %v902_v61 }
 0x7df   : > { %v1221_v62 = vpop.f32.mrf.mxu1 }
 0x7e1   : > { %v1222_v63 = vpop.f32.mrf.mxu1 }
 0x7e2   : > { %v1223_v13 = vadd.f32 %v1222_v63, %v1221_v62 }
 0x7e3   : > { %v1224_v42 = vpop.f32.mrf.mxu1 }
 0x7e4   : > { %979 = vst.msk [vmem:[%s177_s17] sm:$0xff] %vm498_vm7, %v1223_v13 }
 0x7e5   : > { %v1225_v43 = vpop.f32.mrf.mxu1 }
 0x7e6   : > { %v1226_v44 = vadd.f32 %v1225_v43, %v1224_v42 }
 0x7e8   : > { %980 = vst.msk [vmem:[%s177_s17 + $0x8] sm:$0xff] %vm498_vm7, %v1226_v44 }
 0x7e9   : > { %1441 = shalt.err (!%p1438_p0)
}
 0x7ea   : > { %s1442_s3 = scalar_lea.hbm %s1703_s20, 256  ;;  %s1446_s7 = scalar_lea.hbm %s1749_s2, 512 }
 0x7eb   : > { %p1443_p5 = scmp.ne.s32.totalorder %s1703_s20, %s1442_s3  ;;  %p1447_p6 = scmp.lt.s32.totalorder %s1703_s20, %s1749_s2 }
 0x7ec   : > { %p1448_p7 = scmp.lt.s32.totalorder %s1446_s7, %s1442_s3 }
 0x7ed   : > { %p1444_p2 = pnand %p1443_p5, %p1765_p3 }
 0x7ee   : > { %p1449_p4 = por %p1448_p7, %p1447_p6 }
 0x7ef   : > { %p1445_p1 = pneg %p1444_p2 }
 0x7f1   : > { %p1450_p8 = pnand %p1449_p4, %p1445_p1 }
 0x7f3   : > { %1453 = shalt.err (!%p1450_p8)
}
 0x7f4   : > { %s1504_s23 = smov 128   ;;  %s1505_s15 = smov 8  }
 0x7f5   : > { %1310 = dma.vmem_to_hbm [thread:$0]  (%p1765_p3), %s1698_s25, 256, %s1703_s20, %s982_s24, %s1504_s23, %s1504_s23, %s1505_s15  }
 0x7f6 PF: > { %s1010_s17 = sand.u32 1, %s1484_s9   ;;  %p1766_p11 = scmp.ne.s32.totalorder %s1755_s16, 0 }
 0x7f7   : > { %p1767_p9 = scmp.ge.s32.totalorder %s1496_s12, 2  ;;  %s1011_s26 = scalar_lea.sflag [#allocation4], %s1010_s17 }
 0x7f9   : > { %p1321_p10 = pnand %p1767_p9, %p1766_p11 }
 0x7fb   : > { %p1322_p12 = pneg %p1321_p10 }
 0x7fd   : > { %1479 = dma.done.wait (%p1322_p12), %s1011_s26, 256  }
 0x7fe   : > { %1481 = vsyncadd (%p1322_p12), %s1011_s26, 4294967040  ;;  %p16_p13 = scmp.ge.s32.totalorder %s1575_s21, 4   ;;  %s1768_s9 = smov %s1488_s10 }
 0x7ff   : > { %s1769_s10 = smov %s1492_s11  ;;  %s1770_s11 = smov %s1595_s29 }
 0x800   : > { %s1771_s12 = smov %s1575_s21  ;;  %18 = sbr.rel (!%p16_p13) target bundleno = 6 (0x6), region = 78 }
 0x805   :  { %1016 = vsyncpa [#allocation3], 1 }
 0x806   :  { %1018 = vsyncpa [#allocation3 + $0x1], 1 }
 0x807   :  { %1019 = vsyncpa [#allocation6], 1 }
 0x808   :  { %1021 = vsyncpa [#allocation6 + $0x1], 1 }
 0x809   :  { %1022 = vsyncpa [#allocation4], 1 }
 0x80a   :  { %1024 = vsyncpa [#allocation4 + $0x1], 1 }

</bundles_post_ra>
